<compile_context>
chip_gen: v7x
topology: tpu7x:2x2x1
jax: 0.10.0
libtpu: 0.0.40
codegen_flags: <defaults>
</compile_context>

<pallas_src>
import functools

import jax
import jax.numpy as jnp
from jax.experimental import pallas as pl
from jax.experimental.pallas import tpu as pltpu


def _round_up(x, m):
    return ((x + m - 1) // m) * m


_TAPS = tuple((oy, ox) for oy in (-1, 0, 1) for ox in (-1, 0, 1))


# ---------------------------------------------------------------------------
# Roll-direction probe (tiny one-off kernel, cached once per process).
# ---------------------------------------------------------------------------
@functools.lru_cache(maxsize=1)
def _roll_matches_jnp():
    def k(x_ref, o_ref):
        o_ref[...] = pltpu.roll(x_ref[...], 1, axis=1)

    x = jnp.tile(jnp.arange(128, dtype=jnp.float32)[None, :], (8, 1))
    y = pl.pallas_call(k, out_shape=jax.ShapeDtypeStruct((8, 128), jnp.float32))(x)
    return bool(jnp.array_equal(y, jnp.roll(x, 1, axis=1)))


# ---------------------------------------------------------------------------
# Fused kernel
# ---------------------------------------------------------------------------
def _make_kernel(num_layers, k_p, part1_p, part2_p, C4_p, H, W, NB,
                 roll_matches):
    HW = H * W
    LN = NB * HW
    L = num_layers

    # bf16 dense-state scratch layout: [feat_{L-1} | ... | feat_1 | part2 | feat_0]
    sc_part2 = (L - 1) * k_p

    def sc_feat(j):
        return (L - 1 - j) * k_p if j >= 1 else sc_part2 + part2_p

    # f32 output layout (padded concat order):
    #   [part1 | feat_{L-1} | ... | feat_1 | part2 | feat_0]
    o_part2 = part1_p + (L - 1) * k_p

    def o_feat(j):
        return part1_p + (L - 1 - j) * k_p if j >= 1 else o_part2 + part2_p

    def window(i):
        # Layer i's input is a contiguous padded channel window of the scratch.
        if i == 0:
            return sc_part2, part2_p
        return (L - i) * k_p, part2_p + i * k_p

    def lane_shift(x, delta):
        """out[:, p] = x[:, (p + delta) mod LN] (wraps are always masked)."""
        if delta == 0:
            return x
        shift = (-delta) % LN if roll_matches else delta % LN
        return pltpu.roll(x, shift, axis=1)

    def kernel(x_ref, w1_ref, b1_ref, w3_ref, b3_ref, o_ref, dense_ref):
        # ---- carry-through channels -------------------------------------
        if part1_p > 0:
            o_ref[0:part1_p, :] = x_ref[0:part1_p, :]
        part2 = x_ref[part1_p:part1_p + part2_p, :]
        o_ref[o_part2:o_part2 + part2_p, :] = part2
        dense_ref[sc_part2:sc_part2 + part2_p, :] = part2.astype(jnp.bfloat16)

        # ---- 3x3 "same" border masks: built once, pre-broadcast to bf16 --
        lane = jax.lax.broadcasted_iota(jnp.int32, (1, LN), 1)
        pix = lane % HW                       # per-sample pixel index
        hh = pix // W
        ww = pix % W
        masks = []
        for (oy, ox) in _TAPS:
            if oy == 0 and ox == 0:
                masks.append(None)            # center tap needs no mask
                continue
            m = ((hh + oy >= 0) & (hh + oy < H) &
                 (ww + ox >= 0) & (ww + ox < W)).astype(jnp.bfloat16)
            masks.append(jnp.broadcast_to(m, (C4_p, LN)))

        # ---- dense layers (unrolled at trace time) ------------------------
        for i in range(L):
            s, cin = window(i)
            xin = dense_ref[s:s + cin, :]                        # bf16 (cin, LN)
            w1 = w1_ref[i * C4_p:(i + 1) * C4_p, 0:cin]          # bf16
            b1 = b1_ref[i * C4_p:(i + 1) * C4_p, :]              # f32 (C4_p, 1)

            # 1x1 conv (+folded BN) + ReLU: one MXU matmul, f32 accumulation.
            mid = jnp.dot(w1, xin, preferred_element_type=jnp.float32)
            mid = jnp.maximum(mid + b1, 0.0)
            midb = mid.astype(jnp.bfloat16)                      # cast ONCE

            # im2col via bf16 lane rolls, single K = 9*C4_p matmul for the 3x3.
            taps = []
            for t, (oy, ox) in enumerate(_TAPS):
                if oy == 0 and ox == 0:
                    taps.append(midb)
                else:
                    taps.append(lane_shift(midb, oy * W + ox) * masks[t])
            patches = jnp.concatenate(taps, axis=0)              # (9*C4_p, LN) bf16

            w3 = w3_ref[i * k_p:(i + 1) * k_p, :]                # bf16 (k_p, 9*C4_p)
            b3 = b3_ref[i * k_p:(i + 1) * k_p, :]                # f32 (k_p, 1)
            feat = jnp.dot(w3, patches, preferred_element_type=jnp.float32)
            feat = jnp.maximum(feat + b3, 0.0)                   # (k_p, LN) f32

            o_ref[o_feat(i):o_feat(i) + k_p, :] = feat
            if i < L - 1:     # last layer's features are never re-read
                dense_ref[sc_feat(i):sc_feat(i) + k_p, :] = feat.astype(jnp.bfloat16)

    return kernel


# ---------------------------------------------------------------------------
# Wrapper
# ---------------------------------------------------------------------------
def csp_dense_block(x_nchw, packed_params, part1_chnls, num_layers, growth_k):
    """Full CSP_DenseBlock forward.  Input/output are NCHW (PyTorch layout)."""
    N, C, H, W = x_nchw.shape
    HW = H * W
    L = num_layers
    k = growth_k
    part1_c = part1_chnls
    part2_c = C - part1_c
    assert part2_c > 0, "CSP dense part must have at least one channel"

    k_p = _round_up(k, 8)
    C4 = 4 * k
    C4_p = _round_up(C4, 8)
    part1_p = _round_up(part1_c, 8)
    part2_p = _round_up(part2_c, 8)
    cin_p = part1_p + part2_p
    c_pad = part1_p + L * k_p + part2_p          # kernel output channels (padded)
    D = L * k_p + part2_p                        # bf16 dense-state scratch channels

    # ---- batch-chunk size: as many samples per grid step as fits VMEM ----
    per_sample = HW * ((cin_p + c_pad) * 4 * 2 + D * 2 + 9 * C4_p * 2 * 3)
    cap = max(1, (24 << 20) // per_sample)
    NB = N
    if NB > cap:
        NB = max(d for d in range(1, cap + 1) if N % d == 0)
    if NB != N and (NB * HW) % 128 != 0:
        NB = N                                   # sub-batch tiles need 128-lane blocks
    LN = NB * HW

    w1_slab, b1_slab, w3_slab, b3_slab = packed_params

    # ---- wrapper-side layout: NCHW -> (C_padded, N*HW) with zero pad rows ----
    x_cn = jnp.transpose(x_nchw.reshape(N, C, HW), (1, 0, 2)).reshape(C, N * HW)
    pieces = []
    if part1_c > 0:
        pieces.append(x_cn[:part1_c])
        if part1_p > part1_c:
            pieces.append(jnp.zeros((part1_p - part1_c, N * HW), x_cn.dtype))
    pieces.append(x_cn[part1_c:])
    if part2_p > part2_c:
        pieces.append(jnp.zeros((part2_p - part2_c, N * HW), x_cn.dtype))
    xp = jnp.concatenate(pieces, axis=0)

    kernel = _make_kernel(L, k_p, part1_p, part2_p, C4_p, H, W, NB,
                          _roll_matches_jnp())

    out_pad = pl.pallas_call(
        kernel,
        out_shape=jax.ShapeDtypeStruct((c_pad, N * HW), jnp.float32),
        grid=(N // NB,),
        in_specs=[
            pl.BlockSpec((cin_p, LN), lambda n: (0, n)),
            pl.BlockSpec(w1_slab.shape, lambda n: (0, 0)),
            pl.BlockSpec(b1_slab.shape, lambda n: (0, 0)),
            pl.BlockSpec(w3_slab.shape, lambda n: (0, 0)),
            pl.BlockSpec(b3_slab.shape, lambda n: (0, 0)),
        ],
        out_specs=pl.BlockSpec((c_pad, LN), lambda n: (0, n)),
        scratch_shapes=[pltpu.VMEM((D, LN), jnp.bfloat16)],
        compiler_params=pltpu.CompilerParams(
            dimension_semantics=("parallel",)),
    )(xp, w1_slab, b1_slab, w3_slab, b3_slab)

    # ---- crop padding channels, restore NCHW in the final concat order ----
    idx = list(range(part1_c))
    for j in range(L - 1, 0, -1):                # feat_{L-1} ... feat_1
        off = part1_p + (L - 1 - j) * k_p
        idx += list(range(off, off + k))
    off = part1_p + (L - 1) * k_p                # part2
    idx += list(range(off, off + part2_c))
    off = off + part2_p                          # feat_0
    idx += list(range(off, off + k))

    out = out_pad.reshape(c_pad, N, HW)[jnp.asarray(idx)]
    return jnp.transpose(out, (1, 0, 2)).reshape(N, len(idx), H, W)


# ---------------------------------------------------------------------------
# Parameter packing (BN folded, eval semantics) into the kernel's padded slabs.
# ---------------------------------------------------------------------------
def pack_csp_params(ref_params, part1_c, part2_c, num_layers, k):
    L = num_layers
    C4 = 4 * k
    C4_p = _round_up(C4, 8)
    k_p = _round_up(k, 8)
    part2_p = _round_up(part2_c, 8)
    cin_pad = [part2_p if i == 0 else part2_p + i * k_p for i in range(L)]
    cin_pad_max = max(cin_pad)

    def groups(i):
        # Layer-i input channel groups, in order: (real_size, padded_size).
        if i == 0:
            return [(part2_c, part2_p)]
        return [(k, k_p)] * (i - 1) + [(part2_c, part2_p), (k, k_p)]

    w1_rows, b1_rows, w3_rows, b3_rows = [], [], [], []
    for i, (w1, b1, w3, b3) in enumerate(ref_params):
        # --- 1x1 conv: (C4, cin, 1, 1) -> (C4_p, cin_pad_max), group-padded cols
        w1_2d = w1[:, :, 0, 0]
        pieces, c0 = [], 0
        for real, padded in groups(i):
            blk = w1_2d[:, c0:c0 + real]
            pieces.append(jnp.pad(blk, ((0, C4_p - C4), (0, padded - real))))
            c0 += real
        w1_p = jnp.concatenate(pieces, axis=1)
        w1_rows.append(jnp.pad(w1_p, ((0, 0), (0, cin_pad_max - w1_p.shape[1]))))
        b1_rows.append(jnp.pad(b1, (0, C4_p - C4)).reshape(C4_p, 1))
        # --- 3x3 conv: (k, C4, 3, 3) -> (k_p, 9*C4_p), tap-major columns
        w3_r = jnp.transpose(w3, (0, 2, 3, 1))                   # (k, 3, 3, C4)
        w3_r = jnp.pad(w3_r, ((0, k_p - k), (0, 0), (0, 0), (0, C4_p - C4)))
        w3_rows.append(w3_r.reshape(k_p, 9 * C4_p))
        b3_rows.append(jnp.pad(b3, (0, k_p - k)).reshape(k_p, 1))

    w1_slab = jnp.concatenate(w1_rows, axis=0).astype(jnp.bfloat16)
    b1_slab = jnp.concatenate(b1_rows, axis=0)
    w3_slab = jnp.concatenate(w3_rows, axis=0).astype(jnp.bfloat16)
    b3_slab = jnp.concatenate(b3_rows, axis=0)
    return w1_slab, b1_slab, w3_slab, b3_slab


# ---------------------------------------------------------------------------
# Deterministic parameter construction (BN folded, eval semantics).
# ---------------------------------------------------------------------------
def _fold_bn_conv(key, cin, cout, ksize):
    k1, k2, k3, k4, k5 = jax.random.split(key, 5)
    w = jax.random.normal(k1, (cout, cin, ksize, ksize), jnp.float32) * 0.1
    gamma = 1.0 + 0.1 * jax.random.normal(k2, (cout,), jnp.float32)
    beta = 0.1 * jax.random.normal(k3, (cout,), jnp.float32)
    running_mean = 0.1 * jax.random.normal(k4, (cout,), jnp.float32)
    running_var = jnp.abs(1.0 + 0.1 * jax.random.normal(k5, (cout,), jnp.float32))
    eps = 1e-5
    scale = gamma / jnp.sqrt(running_var + eps)
    w_fold = w * scale[:, None, None, None]            # OIHW, folded
    b_fold = beta - running_mean * scale               # (cout,)
    return w_fold, b_fold


# ---------------------------------------------------------------------------
# Pure-JAX f32 reference (same folded parameters) for a correctness check.
# ---------------------------------------------------------------------------
def csp_reference(x_nchw, ref_params, part1_chnls):
    part1 = x_nchw[:, :part1_chnls]
    part2 = x_nchw[:, part1_chnls:]
    dn = ('NCHW', 'OIHW', 'NCHW')
    out = None
    for i, (w1, b1, w3, b3) in enumerate(ref_params):
        inp = part2 if i == 0 else out
        h = jax.lax.conv_general_dilated(inp, w1, (1, 1), 'VALID',
                                         dimension_numbers=dn)
        h = jnp.maximum(h + b1.reshape(1, -1, 1, 1), 0.0)
        y = jax.lax.conv_general_dilated(h, w3, (1, 1), [(1, 1), (1, 1)],
                                         dimension_numbers=dn)
        feat = jnp.maximum(y + b3.reshape(1, -1, 1, 1), 0.0)
        out = (jnp.concatenate([part2, feat], axis=1) if i == 0
               else jnp.concatenate([feat, out], axis=1))
    return jnp.concatenate([part1, out], axis=1)


if __name__ == "__main__":
    # Shapes consistent with CSP_DenseBlock(in_channels=4, num_layers=2, k=4)
    N, C, H, W = 2, 4, 16, 16
    num_layers, growth_k = 2, 4
    part_ratio = 0.5
    part1_chnls = int(C * part_ratio)
    part2_chnls = C - part1_chnls

    key = jax.random.PRNGKey(0)
    key, xk = jax.random.split(key)
    x = jax.random.normal(xk, (N, C, H, W), jnp.float32)

    ref_params = []
    for i in range(num_layers):
        cin = part2_chnls + i * growth_k
        key, ka, kb = jax.random.split(key, 3)
        w1, b1 = _fold_bn_conv(ka, cin, 4 * growth_k, 1)        # 1x1 bottleneck
        w3, b3 = _fold_bn_conv(kb, 4 * growth_k, growth_k, 3)   # 3x3 growth
        ref_params.append((w1, b1, w3, b3))

    packed = pack_csp_params(ref_params, part1_chnls, part2_chnls,
                             num_layers, growth_k)

    out = csp_dense_block(x, packed, part1_chnls, num_layers, growth_k)
    out = jax.block_until_ready(out)

    expected_channels = part1_chnls + part2_chnls + num_layers * growth_k
    assert out.shape == (N, expected_channels, H, W), out.shape

    ref = csp_reference(x, ref_params, part1_chnls)
    max_err = float(jnp.max(jnp.abs(out - ref)))
    assert max_err < 5e-2, f"max abs error {max_err}"

    print("KERNEL_OK")
</pallas_src>

<mosaic_0001>
module attributes {stable_mosaic.version = 11 : i64} {
  func.func @k(%arg0: memref<8x128xf32, #tpu.memory_space<vmem>>, %arg1: memref<8x128xf32, #tpu.memory_space<vmem>>) attributes {dimension_semantics = [], scalar_prefetch = 0 : i64, scratch_operands = 0 : i64, tpu.core_type = #tpu.core_type<tc>} {
    %c0 = arith.constant 0 : index
    %c0_0 = arith.constant 0 : index
    %0 = vector.load %arg0[%c0, %c0_0] : memref<8x128xf32, #tpu.memory_space<vmem>>, vector<8x128xf32>
    %c1_i32 = arith.constant 1 : i32
    %1 = tpu.dynamic_rotate %0 by %c1_i32 dim 1 : vector<8x128xf32>, i32 -> vector<8x128xf32>
    %c0_1 = arith.constant 0 : index
    %c0_2 = arith.constant 0 : index
    %2 = vector.load %arg1[%c0_1, %c0_2] : memref<8x128xf32, #tpu.memory_space<vmem>>, vector<8x128xf32>
    tpu.vector_store %arg1[%c0_1, %c0_2], %1 {strides = array<i32>} : memref<8x128xf32, #tpu.memory_space<vmem>>, vector<8x128xf32>,
    return
  }
}

</mosaic_0001>

<bundles_post_ra>
// kernel: tpu_custom_call.1
= control target key start
LH: loop header
LB: loop body
LE: loop exit
PB: predicated region body
PF: predicated region fallthrough
CT: control target
= control target key end

     0   :  { %6 = vsyncpa [#allocation3], 0  ;;  %s128_s0 = inlined_call_operand.hbm [shape: f32[8,128], index: 0, kind: input, shape index: {}]   ;;  %s129_s1 = inlined_call_operand.hbm [shape: f32[8,128], index: 1, kind: output, shape index: {}]  }
   0x1   :  { %7 = vsyncpa [#allocation4], 0  ;;  %s91_s6 = smov [#allocation2]   ;;  %s43_s10 = scalar_lea.hbm %s128_s0, 128 }
   0x2   :  { %s14_s7 = sshll.u32 %s91_s6, 4  ;;  %p44_p0 = scmp.ne.s32.totalorder %s128_s0, %s43_s10  ;;  %s15_s7 = int_to_ptr.vmem [resolvable:$true] %s14_s7 }
   0x3   :  { %p47_p1 = scmp.lt.u32.totalorder %s43_s10, %s128_s0 }
   0x5   :  { %p49_p2 = pnand %p47_p1, %p44_p0 }
   0x7   :  { %52 = shalt.err (!%p49_p2)
}
   0x8   :  { %s53_s15 = scalar_lea.vmem %s15_s7, 128  ;;  %p58_p4 = scmp.lt.s32.totalorder %s15_s7, %s15_s7 }
   0x9   :  { %p54_p3 = scmp.ne.s32.totalorder %s15_s7, %s53_s15  ;;  %p59_p5 = scmp.lt.s32.totalorder %s53_s15, %s53_s15 }
   0xb   :  { %p60_p6 = por %p59_p5, %p58_p4 }
   0xd   :  { %p61_p7 = pnand %p60_p6, %p54_p3 }
   0xf   :  { %64 = shalt.err (!%p61_p7)
}
  0x10   :  { %17 = dma.hbm_to_vmem [thread:$0]  %s128_s0, 128, %s15_s7, [#allocation3]  }
  0x11   :  { %87 = dma.done.wait [#allocation3], 128  }
  0x12   :  { %88 = vsyncadd [#allocation3], 4294967168  ;;  %v21_v0 = vld [vmem:[#allocation2] sm:$0xff]  ;;  %s92_s18 = smov 1   ;;  %s93_s19 = smov [#allocation5]  }
  0x13   :  { %22 = vrot.lane.b32.xlu0 %v21_v0, %s92_s18  ;;  %s31_s20 = sshll.u32 %s93_s19, 4  ;;  %s32_s20 = int_to_ptr.vmem [resolvable:$true] %s31_s20 }
  0x14   :  { %s65_s21 = scalar_lea.vmem %s32_s20, 128  ;;  %p70_p9 = scmp.lt.s32.totalorder %s32_s20, %s32_s20 }
  0x15   :  { %p66_p8 = scmp.ne.s32.totalorder %s32_s20, %s65_s21  ;;  %p71_p10 = scmp.lt.s32.totalorder %s65_s21, %s65_s21 }
  0x17   :  { %p72_p11 = por %p71_p10, %p70_p9 }
  0x19   :  { %p73_p12 = pnand %p72_p11, %p66_p8 }
  0x85   :  { %v23_v1 = vpop.permute.xlu0 %22 }
  0x86   :  { %24 = vst [vmem:[#allocation5] sm:$0xff] %v23_v1 }
  0x87   :  { %76 = shalt.err (!%p73_p12)
}
  0x88   :  { %s77_s0 = scalar_lea.hbm %s129_s1, 128 }
  0x89   :  { %p78_p13 = scmp.ne.s32.totalorder %s129_s1, %s77_s0  ;;  %p81_p0 = scmp.lt.u32.totalorder %s77_s0, %s129_s1 }
  0x8b   :  { %p83_p1 = pnand %p81_p0, %p78_p13 }
  0x8d   :  { %86 = shalt.err (!%p83_p1)
}
  0x8e   :  { %34 = dma.vmem_to_hbm [thread:$0]  %s32_s20, 128, %s129_s1, [#allocation4]  }
  0x8f   :  { %89 = dma.done.wait [#allocation4], 128  }
  0x90   :  { %90 = vsyncadd [#allocation4], 4294967168 }
  0x91   :  { %38 = vsyncpa [#allocation3], 1 }
  0x92   :  { %39 = vsyncpa [#allocation4], 1 }

</bundles_post_ra>
